<compile_context>
chip_gen: v7x
topology: tpu7x:2x2x1
jax: 0.10.0
libtpu: 0.0.40
codegen_flags: <defaults>
</compile_context>

<pallas_src>
import jax
import jax.numpy as jnp
from jax.experimental import pallas as pl
from jax.experimental.pallas import tpu as pltpu


# -----------------------------------------------------------------------------
# Path 1 (preferred): single HBM -> HBM DMA.  Works for any shape/dtype, no
# VMEM transit, no wrapper reshapes.
# -----------------------------------------------------------------------------
def _identity_dma_kernel(x_hbm_ref, o_hbm_ref, sem):
    copy = pltpu.make_async_copy(x_hbm_ref, o_hbm_ref, sem)
    copy.start()
    copy.wait()


def identity(x: jax.Array) -> jax.Array:
    """Identity.forward(x) -> x via one HBM-to-HBM DMA."""
    if x.ndim == 0 or x.size == 0:
        # Nothing to copy; identity semantics are just the input itself.
        return x
    return pl.pallas_call(
        _identity_dma_kernel,
        out_shape=jax.ShapeDtypeStruct(x.shape, x.dtype),
        in_specs=[pl.BlockSpec(memory_space=pl.ANY)],   # raw HBM ref, no auto-DMA
        out_specs=pl.BlockSpec(memory_space=pl.ANY),    # raw HBM ref, written by the DMA
        scratch_shapes=[pltpu.SemaphoreType.DMA],
    )(x)


# -----------------------------------------------------------------------------
# Path 2: large, lane-dense tiled VMEM copy (demonstrates the tuned BlockSpec
# pipeline; useful as a template when the copy is fused with real compute).
# -----------------------------------------------------------------------------
def _identity_copy_kernel(x_ref, o_ref):
    o_ref[...] = x_ref[...]


_LANE_CANDIDATES = (1024, 512, 256, 128)   # lane-dense last dims (multiples of 128)
_TARGET_BLOCK_BYTES = 2 << 20              # ~2 MiB/block; 2in+2out buffers = 8 MiB


def _min_sublane(itemsize: int) -> int:
    # Native second-minor tiling: 8 rows (32-bit), 16 (16-bit), 32 (8-bit).
    return max(8, 32 // max(1, itemsize))


def _tiled_copy_2d(x2d: jax.Array, tile_rows: int, lane: int) -> jax.Array:
    rows = x2d.shape[0]
    grid = (pl.cdiv(rows, tile_rows),)
    return pl.pallas_call(
        _identity_copy_kernel,
        out_shape=jax.ShapeDtypeStruct((rows, lane), x2d.dtype),
        grid_spec=pltpu.PrefetchScalarGridSpec(
            num_scalar_prefetch=0,
            grid=grid,
            in_specs=[pl.BlockSpec((tile_rows, lane), lambda i: (i, 0))],
            out_specs=pl.BlockSpec((tile_rows, lane), lambda i: (i, 0)),
        ),
        compiler_params=pltpu.CompilerParams(
            dimension_semantics=("parallel",),   # lets v7x shard the grid across 2 TCs
            vmem_limit_bytes=32 << 20,           # explicit; safe on v5e/v6e/v7x
        ),
    )(x2d)


def identity_tiled(x: jax.Array) -> jax.Array:
    """Identity.forward(x) -> x via a tiled VMEM copy with large lane-dense blocks."""
    if x.ndim == 0 or x.size == 0:
        return x

    n = x.size
    itemsize = x.dtype.itemsize
    sub = _min_sublane(itemsize)

    # Fast path: find a lane width so that x reshapes contiguously (zero-copy) to
    # (rows, lane) with rows a multiple of the native sublane tiling -> no pad,
    # no trailing slice, no extra HBM passes.
    lane = None
    for cand in _LANE_CANDIDATES:
        if n % cand == 0 and (n // cand) % sub == 0:
            lane = cand
            break

    if lane is not None:
        rows = n // lane
        tile_rows = (_TARGET_BLOCK_BYTES // (lane * itemsize)) // sub * sub
        tile_rows = max(sub, min(rows, tile_rows))
        out2d = _tiled_copy_2d(x.reshape(rows, lane), tile_rows, lane)
        return out2d.reshape(x.shape)

    # Ragged fallback: pad the flat view up to a whole number of large tiles
    # (pad cost <= one tile; no divisor search that could degrade to tiny tiles).
    lane = 128
    tile_rows = max(sub, (_TARGET_BLOCK_BYTES // (lane * itemsize)) // sub * sub)
    tile_elems = tile_rows * lane
    n_pad = pl.cdiv(n, tile_elems) * tile_elems
    x2d = jnp.pad(jnp.ravel(x), (0, n_pad - n)).reshape(n_pad // lane, lane)
    out2d = _tiled_copy_2d(x2d, tile_rows, lane)
    return out2d.reshape(-1)[:n].reshape(x.shape)


if __name__ == "__main__":
    key = jax.random.PRNGKey(0)
    # NCHW feature map, consistent with the conv-net context of the module.
    x = jax.random.normal(key, (2, 4, 16, 16), dtype=jnp.float32)

    y_dma = identity(x)
    y_tiled = identity_tiled(x)
    jax.block_until_ready((y_dma, y_tiled))

    for name, y in (("dma", y_dma), ("tiled", y_tiled)):
        assert y.shape == x.shape, f"[{name}] shape mismatch: {y.shape} vs {x.shape}"
        assert y.dtype == x.dtype, f"[{name}] dtype mismatch: {y.dtype} vs {x.dtype}"
        assert bool(jnp.array_equal(y, x)), f"[{name}] output differs from input"

    print("KERNEL_OK")
</pallas_src>

<mosaic_0001>
module attributes {stable_mosaic.version = 11 : i64} {
  func.func @_identity_dma_kernel(%arg0: memref<2x4x16x16xf32, #tpu.memory_space<any>>, %arg1: memref<2x4x16x16xf32, #tpu.memory_space<any>>, %arg2: memref<!tpu.dma_semaphore, #tpu.memory_space<semaphore_mem>>) attributes {dimension_semantics = [], scalar_prefetch = 0 : i64, scratch_operands = 1 : i64, tpu.core_type = #tpu.core_type<tc>} {
    tpu.enqueue_dma source(%arg0 : memref<2x4x16x16xf32, #tpu.memory_space<any>>) target(%arg1 : memref<2x4x16x16xf32, #tpu.memory_space<any>>) target_semaphore(%arg2 : memref<!tpu.dma_semaphore, #tpu.memory_space<semaphore_mem>>)
    tpu.wait_dma2 semaphore(%arg2 : memref<!tpu.dma_semaphore, #tpu.memory_space<semaphore_mem>>) src(%arg0 : memref<2x4x16x16xf32, #tpu.memory_space<any>>) dst(%arg1 : memref<2x4x16x16xf32, #tpu.memory_space<any>>)
    return
  }
}

</mosaic_0001>

<bundles_post_ra>
// kernel: tpu_custom_call.1
= control target key start
LH: loop header
LB: loop body
LE: loop exit
PB: predicated region body
PF: predicated region fallthrough
CT: control target
= control target key end

     0   :  { %s36_s6 = smov [#allocation2]   ;;  %s37_s7 = smov [#allocation3]   ;;  %s55_s0 = inlined_call_operand.hbm [shape: f32[2,4,16,16], index: 0, kind: input, shape index: {}]   ;;  %s56_s1 = inlined_call_operand.hbm [shape: f32[2,4,16,16], index: 1, kind: output, shape index: {}]  }
   0x1   :  { %s38_s8 = smov 0  }
   0x2   :  { %18 = dma.general %s55_s0, 2048, %s56_s1, %s36_s6, %s37_s7, [#allocation4], %s38_s8, 0  }
   0x3   :  { %34 = dma.done.wait [#allocation2], 2048 }
   0x4   :  { %35 = vsyncadd [#allocation2], 4294965248 }
   0x5   :  { %24 = vsyncmov [#allocation2] }
   0x8   :  { %s25_s13 = vpop.sfrf %24 }
   0x9   :  { %p30_p0 = scmp.ne.s32.totalorder %s25_s13, 0 }
   0xb   :  { %29 = shalt.err (%p30_p0)  }

</bundles_post_ra>
